<compile_context>
chip_gen: v7x
topology: tpu7x:2x2x1
jax: 0.10.0
libtpu: 0.0.40
codegen_flags: <defaults>
</compile_context>

<pallas_src>
import math
from functools import partial

import jax
import jax.numpy as jnp
from jax import lax
from jax.experimental import pallas as pl
from jax.experimental.pallas import tpu as pltpu


def _causal_head_kernel(x_ref, scale_ref, corr_ref, w_ref, o_ref, w_scaled_ref,
                        *, eps, inv_c):
    # x_ref        : (TM, C)   row tile of one frame (storage dtype, e.g. bf16)
    # scale_ref    : (C, 1)    per-frame scale = 1 + mod1 + e, f32 (column layout)
    # corr_ref     : (2, OD)   row 0 = base = shift @ W^T + b ; row 1 = wsum = scale @ W^T (f32)
    # w_ref        : (C, OD)   head weight transposed to [in, out] (bf16), grid-resident
    # o_ref        : (TM, OD)  output tile
    # w_scaled_ref : (C, OD)   VMEM scratch: W' = diag(scale) @ W^T, rebuilt once per frame

    # --- per-frame fold (first row tile of each frame only) ------------------
    @pl.when(pl.program_id(1) == 0)
    def _():
        w_f32 = w_ref[...].astype(jnp.float32)                 # (C, OD)
        w_scaled_ref[...] = (w_f32 * scale_ref[...]).astype(w_scaled_ref.dtype)

    # --- per-tile body --------------------------------------------------------
    x = x_ref[...]                                             # (TM, C) as loaded
    xf = x.astype(jnp.float32)

    # LayerNorm statistics (one-pass, f32 accumulation; matches nn.LayerNorm's
    # biased variance; mean/var over the full C since the tile spans all of C).
    s1 = jnp.sum(xf, axis=-1, keepdims=True)                   # (TM, 1)
    s2 = jnp.sum(xf * xf, axis=-1, keepdims=True)              # (TM, 1)
    mean = s1 * inv_c
    var = jnp.maximum(s2 * inv_c - mean * mean, 0.0)
    inv_std = lax.rsqrt(var + eps)                             # (TM, 1)

    # MXU matmul on the as-loaded (bf16) tile against the folded weight.
    xw = jnp.dot(x.astype(w_scaled_ref.dtype), w_scaled_ref[...],
                 preferred_element_type=jnp.float32)           # (TM, OD) f32

    # Epilogue: y = inv_std * (x @ W') + (base - inv_std * mean * wsum)
    base = corr_ref[0:1, :]                                    # (1, OD) f32
    wsum = corr_ref[1:2, :]                                    # (1, OD) f32
    out = inv_std * xw + (base - (inv_std * mean) * wsum)

    o_ref[...] = out.astype(o_ref.dtype)


def _vmem_capacity_bytes():
    """Generation-aware VMEM capacity; falls back to the smallest gen (v7x, 64 MiB)."""
    try:
        info = pltpu.get_tpu_info()
        for attr in ("vmem_capacity_bytes", "vmem_bytes", "vmem_size_bytes"):
            v = getattr(info, attr, None)
            if v:
                return int(v)
    except Exception:
        pass
    return 64 * 1024 * 1024


def _pick_row_tile(fs, C, OD, x_itemsize, out_itemsize, budget_bytes):
    """Largest row tile TM (divisor of fs, multiple of 8, <= 1024) within budget."""
    def buf_bytes(t):
        stream = 2 * t * C * x_itemsize + 2 * t * OD * out_itemsize   # double-buffered DMA
        f32_tmp = 2 * t * C * 4 + t * OD * 4                          # xf, xf*xf, f32 out tile
        return stream + f32_tmp

    cap = min(fs, 1024)
    # Preferred: divisor of fs that is a multiple of 8 -> no ragged last tile.
    for t in range(cap, 7, -1):
        if fs % t == 0 and t % 8 == 0 and buf_bytes(t) <= budget_bytes:
            return t
    # Small / irregular frames: a full-frame block is always a legal block shape.
    if fs <= 8 or buf_bytes(fs) <= budget_bytes:
        return fs
    # Ragged fallback: largest multiple of 8 within budget (padded rows in the
    # last tile are computed but dropped by the blocked writeback).
    t = max(8, (cap // 8) * 8)
    while t > 8 and buf_bytes(t) > budget_bytes:
        t -= 8
    return t


def causal_head_forward(x, e, modulation, head_w, head_b, eps=1e-6,
                        compute_dtype=jnp.bfloat16):
    """
    Args:
      x          : [B, L1, C]      (activations; bf16 recommended)
      e          : [B, F, 1, C]
      modulation : [1, 2, C]
      head_w     : [OD, C]         (PyTorch nn.Linear weight layout)
      head_b     : [OD]
    Returns:
      [B, F, L1 // F, OD]  in x.dtype
    """
    B, L1, C = x.shape
    F = e.shape[1]
    assert L1 % F == 0, f"L1={L1} must be divisible by num_frames={F}"
    fs = L1 // F
    OD = head_w.shape[0]
    f32 = jnp.float32

    # --- wrapper glue: tiny per-frame precomputations (all O(B*F*C) / O(B*F*OD)) ---
    e_f32 = e[:, :, 0, :].astype(f32)                           # [B, F, C]
    m = modulation.astype(f32)
    shift = m[0, 0][None, None, :] + e_f32                      # [B, F, C]
    scale = 1.0 + m[0, 1][None, None, :] + e_f32                # [B, F, C]

    w_f32 = head_w.astype(f32)                                  # [OD, C]
    base = jnp.einsum("bfc,oc->bfo", shift, w_f32) + head_b.astype(f32)[None, None, :]
    wsum = jnp.einsum("bfc,oc->bfo", scale, w_f32)
    corr = jnp.stack([base, wsum], axis=2).reshape(B * F, 2, OD)        # f32
    scale_col = scale.reshape(B * F, C, 1)                              # f32 column per frame

    x_frames = x.reshape(B * F, fs, C)                          # storage dtype
    w_t = head_w.T.astype(compute_dtype)                        # [C, OD] bf16
    out_dtype = x.dtype

    # --- generation-aware tiling / VMEM limits ---
    vmem_cap = _vmem_capacity_bytes()
    budget = int(0.55 * vmem_cap)                               # streaming buffers + f32 temporaries
    tm = _pick_row_tile(fs, C, OD,
                        jnp.dtype(x.dtype).itemsize,
                        jnp.dtype(out_dtype).itemsize,
                        budget)
    grid = (B * F, pl.cdiv(fs, tm))

    out = pl.pallas_call(
        partial(_causal_head_kernel, eps=eps, inv_c=1.0 / C),
        out_shape=jax.ShapeDtypeStruct((B * F, fs, OD), out_dtype),
        grid_spec=pltpu.PrefetchScalarGridSpec(
            num_scalar_prefetch=0,
            grid=grid,
            in_specs=[
                # x row tile; leading frame dim squeezed -> kernel sees (TM, C)
                pl.BlockSpec((None, tm, C), lambda i, j: (i, j, 0)),
                # per-frame scale column; constant across row tiles (fetched once per frame)
                pl.BlockSpec((None, C, 1), lambda i, j: (i, 0, 0)),
                # per-frame (base, wsum) correction rows
                pl.BlockSpec((None, 2, OD), lambda i, j: (i, 0, 0)),
                # head weight, grid-resident
                pl.BlockSpec((C, OD), lambda i, j: (0, 0)),
            ],
            out_specs=pl.BlockSpec((None, tm, OD), lambda i, j: (i, j, 0)),
            scratch_shapes=[pltpu.VMEM((C, OD), compute_dtype)],   # folded weight W'
        ),
        compiler_params=pltpu.CompilerParams(
            # Frame axis parallel (v7x 2-TC sharding); row-tile axis must stay
            # sequential because the folded-weight scratch is rebuilt at j == 0.
            dimension_semantics=("parallel", "arbitrary"),
            vmem_limit_bytes=int(0.90 * vmem_cap),
        ),
    )(x_frames, scale_col, corr, w_t)

    return out.reshape(B, F, fs, OD)


def _reference(x, e, modulation, head_w, head_b, eps=1e-6):
    """Pure-JAX f32 reference mirroring the PyTorch forward."""
    x = x.astype(jnp.float32)
    e = e.astype(jnp.float32)
    modulation = modulation.astype(jnp.float32)
    head_w = head_w.astype(jnp.float32)
    head_b = head_b.astype(jnp.float32)

    B, L1, C = x.shape
    F = e.shape[1]
    fs = L1 // F
    ecomb = modulation[None, :, :, :] + e                  # [B, F, 2, C]
    e0 = ecomb[:, :, 0:1, :]
    e1 = ecomb[:, :, 1:2, :]
    mean = jnp.mean(x, axis=-1, keepdims=True)
    var = jnp.mean((x - mean) ** 2, axis=-1, keepdims=True)
    xn = (x - mean) * lax.rsqrt(var + eps)
    xm = xn.reshape(B, F, fs, C) * (1.0 + e1) + e0
    return jnp.einsum("bfsc,oc->bfso", xm, head_w) + head_b


if __name__ == "__main__":
    # Module config (small, synthetic)
    dim = 32                      # C
    out_dim = 4
    patch_size = (1, 2, 2)        # prod = 4  ->  OD = 16
    eps = 1e-6
    OD = math.prod(patch_size) * out_dim

    B, F, fs = 2, 2, 8
    L1 = F * fs

    key = jax.random.PRNGKey(0)
    kx, ke, km, kw, kb = jax.random.split(key, 5)

    # Activations stored in bf16 (memory-bound path; halves HBM traffic).
    x = jax.random.normal(kx, (B, L1, dim), dtype=jnp.float32).astype(jnp.bfloat16)
    e = jax.random.normal(ke, (B, F, 1, dim), dtype=jnp.float32).astype(jnp.bfloat16)

    # Deterministic parameter init (matches shapes from __init__).
    modulation = jax.random.normal(km, (1, 2, dim), dtype=jnp.float32) / (dim ** 0.5)
    bound = 1.0 / (dim ** 0.5)
    head_w = jax.random.uniform(kw, (OD, dim), minval=-bound, maxval=bound,
                                dtype=jnp.float32)
    head_b = jax.random.uniform(kb, (OD,), minval=-bound, maxval=bound,
                                dtype=jnp.float32)

    out = causal_head_forward(x, e, modulation, head_w, head_b, eps)
    out = jax.block_until_ready(out)

    ref = _reference(x, e, modulation, head_w, head_b, eps)
    assert out.shape == (B, F, fs, OD), out.shape
    out_f32 = out.astype(jnp.float32)
    max_err = float(jnp.max(jnp.abs(out_f32 - ref)))
    # bf16 folded weight + bf16 activations/output -> looser tolerance than pure f32.
    assert jnp.allclose(out_f32, ref, atol=5e-2, rtol=5e-2), max_err

    print("KERNEL_OK")
</pallas_src>

<mosaic_0001>
module attributes {stable_mosaic.version = 11 : i64} {
  func.func @_causal_head_kernel(%arg0: i32, %arg1: i32, %arg2: memref<1x8x32xbf16, #tpu.memory_space<vmem>>, %arg3: memref<1x32x1xf32, #tpu.memory_space<vmem>>, %arg4: memref<1x2x16xf32, #tpu.memory_space<vmem>>, %arg5: memref<32x16xbf16, #tpu.memory_space<vmem>>, %arg6: memref<1x8x16xbf16, #tpu.memory_space<vmem>>, %arg7: memref<32x16xbf16, #tpu.memory_space<vmem>>) attributes {dimension_semantics = [#tpu.dimension_semantics<parallel>, #tpu.dimension_semantics<arbitrary>], iteration_bounds = array<i64: 4, 1>, scalar_prefetch = 0 : i64, scratch_operands = 1 : i64, tpu.core_type = #tpu.core_type<tc>, window_params = [{transform_indices = @transform_0, window_bounds = array<i64: 1, 8, 32>}, {transform_indices = @transform_1, window_bounds = array<i64: 1, 32, 1>}, {transform_indices = @transform_2, window_bounds = array<i64: 1, 2, 16>}, {pipeline_mode = #tpu.pipeline_mode<synchronous>, transform_indices = @transform_3, window_bounds = array<i64: 32, 16>}, {transform_indices = @transform_4, window_bounds = array<i64: 1, 8, 16>}]} {
    %c0_i32 = arith.constant 0 : i32
    %0 = arith.cmpi eq, %arg1, %c0_i32 : i32
    %1 = arith.extui %0 : i1 to i32
    %c0_i32_0 = arith.constant 0 : i32
    %2 = arith.cmpi ne, %1, %c0_i32_0 : i32
    scf.if %2 {
      %c0_19 = arith.constant 0 : index
      %c0_20 = arith.constant 0 : index
      %41 = vector.load %arg5[%c0_19, %c0_20] : memref<32x16xbf16, #tpu.memory_space<vmem>>, vector<32x16xbf16>
      %42 = arith.extf %41 : vector<32x16xbf16> to vector<32x16xf32>
      %c0_21 = arith.constant 0 : index
      %c0_22 = arith.constant 0 : index
      %c0_23 = arith.constant 0 : index
      %43 = vector.load %arg3[%c0_21, %c0_22, %c0_23] : memref<1x32x1xf32, #tpu.memory_space<vmem>>, vector<1x32x1xf32>
      %44 = vector.shape_cast %43 : vector<1x32x1xf32> to vector<32x1xf32>
      %45 = vector.broadcast %44 : vector<32x1xf32> to vector<32x16xf32>
      %46 = arith.mulf %42, %45 : vector<32x16xf32>
      %47 = arith.truncf %46 : vector<32x16xf32> to vector<32x16xbf16>
      %c0_24 = arith.constant 0 : index
      %c0_25 = arith.constant 0 : index
      %48 = vector.load %arg7[%c0_24, %c0_25] : memref<32x16xbf16, #tpu.memory_space<vmem>>, vector<32x16xbf16>
      tpu.vector_store %arg7[%c0_24, %c0_25], %47 {strides = array<i32>} : memref<32x16xbf16, #tpu.memory_space<vmem>>, vector<32x16xbf16>,
    } else {
    }
    %c0 = arith.constant 0 : index
    %c0_1 = arith.constant 0 : index
    %c0_2 = arith.constant 0 : index
    %3 = vector.load %arg2[%c0, %c0_1, %c0_2] : memref<1x8x32xbf16, #tpu.memory_space<vmem>>, vector<1x8x32xbf16>
    %4 = vector.shape_cast %3 : vector<1x8x32xbf16> to vector<8x32xbf16>
    %5 = arith.extf %4 : vector<8x32xbf16> to vector<8x32xf32>
    %cst = arith.constant dense<0.000000e+00> : vector<8xf32>
    %6 = vector.multi_reduction <add>, %5, %cst [1] : vector<8x32xf32> to vector<8xf32>
    %7 = vector.shape_cast %6 : vector<8xf32> to vector<8x1xf32>
    %8 = arith.mulf %5, %5 : vector<8x32xf32>
    %cst_3 = arith.constant dense<0.000000e+00> : vector<8xf32>
    %9 = vector.multi_reduction <add>, %8, %cst_3 [1] : vector<8x32xf32> to vector<8xf32>
    %10 = vector.shape_cast %9 : vector<8xf32> to vector<8x1xf32>
    %cst_4 = arith.constant 3.125000e-02 : f32
    %11 = vector.broadcast %cst_4 : f32 to vector<8x1xf32>
    %12 = arith.mulf %7, %11 : vector<8x1xf32>
    %cst_5 = arith.constant 3.125000e-02 : f32
    %13 = vector.broadcast %cst_5 : f32 to vector<8x1xf32>
    %14 = arith.mulf %10, %13 : vector<8x1xf32>
    %15 = arith.mulf %12, %12 : vector<8x1xf32>
    %16 = arith.subf %14, %15 : vector<8x1xf32>
    %cst_6 = arith.constant 0.000000e+00 : f32
    %17 = vector.broadcast %cst_6 : f32 to vector<8x1xf32>
    %18 = arith.maximumf %16, %17 : vector<8x1xf32>
    %cst_7 = arith.constant 9.99999997E-7 : f32
    %19 = vector.broadcast %cst_7 : f32 to vector<8x1xf32>
    %20 = arith.addf %18, %19 : vector<8x1xf32>
    %21 = math.rsqrt %20 : vector<8x1xf32>
    %c0_8 = arith.constant 0 : index
    %c0_9 = arith.constant 0 : index
    %22 = vector.load %arg7[%c0_8, %c0_9] : memref<32x16xbf16, #tpu.memory_space<vmem>>, vector<32x16xbf16>
    %cst_10 = arith.constant dense<0.000000e+00> : vector<8x16xf32>
    %23 = tpu.matmul %4, %22, %cst_10 {dimension_numbers = #tpu.dot_dimension_numbers<[1], [0], [0], [1], [0, 0, 1, 1], [], []>} : vector<8x32xbf16>, vector<32x16xbf16>, vector<8x16xf32> -> vector<8x16xf32>
    %c0_11 = arith.constant 0 : index
    %c0_12 = arith.constant 0 : index
    %c0_13 = arith.constant 0 : index
    %24 = vector.load %arg4[%c0_11, %c0_12, %c0_13] : memref<1x2x16xf32, #tpu.memory_space<vmem>>, vector<1x1x16xf32>
    %25 = vector.shape_cast %24 : vector<1x1x16xf32> to vector<1x16xf32>
    %c0_14 = arith.constant 0 : index
    %c1 = arith.constant 1 : index
    %c0_15 = arith.constant 0 : index
    %26 = vector.load %arg4[%c0_14, %c1, %c0_15] : memref<1x2x16xf32, #tpu.memory_space<vmem>>, vector<1x1x16xf32>
    %27 = vector.shape_cast %26 : vector<1x1x16xf32> to vector<1x16xf32>
    %28 = vector.broadcast %21 : vector<8x1xf32> to vector<8x16xf32>
    %29 = arith.mulf %28, %23 : vector<8x16xf32>
    %30 = arith.mulf %21, %12 : vector<8x1xf32>
    %31 = vector.broadcast %30 : vector<8x1xf32> to vector<8x16xf32>
    %32 = vector.broadcast %27 : vector<1x16xf32> to vector<8x16xf32>
    %33 = arith.mulf %31, %32 : vector<8x16xf32>
    %34 = vector.broadcast %25 : vector<1x16xf32> to vector<8x16xf32>
    %35 = arith.subf %34, %33 : vector<8x16xf32>
    %36 = arith.addf %29, %35 : vector<8x16xf32>
    %37 = arith.truncf %36 : vector<8x16xf32> to vector<8x16xbf16>
    %c0_16 = arith.constant 0 : index
    %c0_17 = arith.constant 0 : index
    %c0_18 = arith.constant 0 : index
    %38 = vector.load %arg6[%c0_16, %c0_17, %c0_18] : memref<1x8x16xbf16, #tpu.memory_space<vmem>>, vector<1x8x16xbf16>
    %39 = vector.shape_cast %38 : vector<1x8x16xbf16> to vector<8x16xbf16>
    %40 = vector.shape_cast %37 : vector<8x16xbf16> to vector<1x8x16xbf16>
    tpu.vector_store %arg6[%c0_16, %c0_17, %c0_18], %40 {strides = array<i32>} : memref<1x8x16xbf16, #tpu.memory_space<vmem>>, vector<1x8x16xbf16>,
    return
  }
  func.func @transform_0(%arg0: i32, %arg1: i32) -> (i32, i32, i32) {
    %c0_i32 = arith.constant 0 : i32
    %c0_i32_0 = arith.constant 0 : i32
    return %arg0, %arg1, %c0_i32 : i32, i32, i32
  }
  func.func @transform_1(%arg0: i32, %arg1: i32) -> (i32, i32, i32) {
    %c0_i32 = arith.constant 0 : i32
    %c0_i32_0 = arith.constant 0 : i32
    %c0_i32_1 = arith.constant 0 : i32
    return %arg0, %c0_i32, %c0_i32_0 : i32, i32, i32
  }
  func.func @transform_2(%arg0: i32, %arg1: i32) -> (i32, i32, i32) {
    %c0_i32 = arith.constant 0 : i32
    %c0_i32_0 = arith.constant 0 : i32
    %c0_i32_1 = arith.constant 0 : i32
    return %arg0, %c0_i32, %c0_i32_0 : i32, i32, i32
  }
  func.func @transform_3(%arg0: i32, %arg1: i32) -> (i32, i32) {
    %c0_i32 = arith.constant 0 : i32
    %c0_i32_0 = arith.constant 0 : i32
    %c0_i32_1 = arith.constant 0 : i32
    return %c0_i32, %c0_i32_0 : i32, i32
  }
  func.func @transform_4(%arg0: i32, %arg1: i32) -> (i32, i32, i32) {
    %c0_i32 = arith.constant 0 : i32
    %c0_i32_0 = arith.constant 0 : i32
    return %arg0, %arg1, %c0_i32 : i32, i32, i32
  }
}

</mosaic_0001>

<bundles_post_ra>
// kernel: tpu_custom_call.1
= control target key start
LH: loop header
LB: loop body
LE: loop exit
PB: predicated region body
PF: predicated region fallthrough
CT: control target
= control target key end

     0   :  { %9 = vsyncpa [#allocation4], 0  ;;  %s832_s0 = inlined_call_operand.vmem [shape: bf16[4,8,32], index: 0, kind: input, shape index: {}]   ;;  %s833_s1 = inlined_call_operand.vmem [shape: f32[4,32,1], index: 1, kind: input, shape index: {}]   ;;  %s834_s2 = inlined_call_operand.vmem [shape: f32[4,2,16], index: 2, kind: input, shape index: {}]   ;;  %s835_s3 = inlined_call_operand.vmem [shape: bf16[32,16], index: 3, kind: input, shape index: {}]   ;;  %s836_s4 = inlined_call_operand.hbm [shape: bf16[4,8,16], index: 4, kind: output, shape index: {}]  }
   0x1   :  { %11 = vsyncpa [#allocation4 + $0x1], 0  ;;  %s700_s15 = smov 0   ;;  %s702_s16 = smov 0  }
   0x2   :  { %s704_s17 = smov 0   ;;  %s706_s18 = smov 0  }
   0x3   :  { %s708_s19 = smov 0   ;;  %s710_s20 = smov 0  }
   0x4 LB: > { %s491_s21 = sadd.s32 4294967295, %s669_s20   ;;  %s492_s22 = sadd.s32 4294967294, %s669_s20   ;;  %s669_s20 = sphi %s710_s20, %s17_s20   ;;  %s665_s19 = sphi %s708_s19, %s843_s19   ;;  %s661_s18 = sphi %s706_s18, %s842_s18   ;;  %s657_s17 = sphi %s704_s17, %s841_s17   ;;  %s653_s16 = sphi %s702_s16, %s840_s16   ;;  %s649_s15 = sphi %s700_s15, %s839_s15  }
   0x5   : > { %s29_s23 = sadd.s32 1, %s665_s19  ;;  %s139_s24 = sadd.s32 1, %s657_s17 }
   0x6   : > { %p31_p0 = scmp.ge.s32.totalorder %s29_s23, 4  ;;  %p149_p1 = scmp.ne.s32.totalorder %s657_s17, %s653_s16 }
   0x7   : > { %p150_p2 = scmp.eq.s32.totalorder %s491_s21, 3  ;;  %p155_p3 = scmp.ne.s32.totalorder %s653_s16, %s649_s15 }
   0x8   : > { %s845_s23 = smov (%p31_p0, %s29_s23), 0  ;;  %p156_p5 = scmp.eq.s32.totalorder %s492_s22, 3 }
   0x9   : > { %p740_p4 = por %p150_p2, %p149_p1  ;;  %s134_s26 = ssub.s32 %s665_s19, %s845_s23 }
   0xa   : > { %p495_p6 = scmp.ge.s32.totalorder %s669_s20, 1  ;;  %p137_p7 = scmp.eq.s32.totalorder %s134_s26, 0 }
   0xb   : > { %p747_p8 = por %p156_p5, %p155_p3  ;;  %p202_p9 = scmp.lt.s32.totalorder %s669_s20, 5 }
   0xc   : > { %s753_s28 = scalar_select %p137_p7, %s657_s17, %s139_s24  }
   0xd   : > { %p203_p10 = pnand %p495_p6, %p202_p9 }
   0xe   : > { %p239_p11 = scmp.lt.s32.totalorder (!%p203_p10), %s661_s18, 3  ;;  %v671_v0 = vmov (!%p203_p10), 0   ;;  %v672_v5 = vmov (!%p203_p10), 0.0   ;;  %vm673_vm0 = vmmov (!%p203_p10), 0   ;;  %vm303_vm1 = vcmask (!%p203_p10), 261120   ;;  %v517_v11 = vld [vmem:[%s835_s3 + $0x8] sm:$0xff] (!%p203_p10)  }
   0xf   : > { %206 = sbr.rel (%p203_p10) target bundleno = 410 (0x19a), region = 36  ;;  %588 = vset.pattern.permute.xlu1 (!%p203_p10), %v671_v0  ;;  %587 = vset.pattern.permute.xlu0 (!%p203_p10), %v671_v0  ;;  %v510_v12 = vld [vmem:[%s835_s3] sm:$0xff] (!%p203_p10)   ;;  %v515_v13 = vunpack.c.l.bf16 (!%p203_p10), %v517_v11  ;;  %v516_v17 = vunpack.c.h.bf16 (!%p203_p10), %v517_v11  ;;  %vm298_vm2 = vcmask (!%p203_p10), 130048   ;;  %s236_s5 = sand.u32 (!%p203_p10), 1, %s653_s16   ;;  %vm379_vm3 = vcmask (!%p203_p10), 125952  }
  0x10   : > { %521 = vmatprep.subr.bf16.mxu0 (!%p203_p10), %v672_v5  ;;  %525 = vmatprep.mubr.msk.bf16.mxu0 (!%p203_p10), %vm673_vm0, %v672_v5  ;;  %v511_v16 = vunpack.c.l.bf16 (!%p203_p10), %v510_v12  ;;  %v512_v18 = vunpack.c.h.bf16 (!%p203_p10), %v510_v12  ;;  %s496_s6 = sshll.u32 (!%p203_p10), %s236_s5, 2  ;;  %s382_s12 = scalar_lea.sflag (!%p203_p10), [#allocation4], %s236_s5 }
  0x16   : > { %s757_s29 = scalar_select %p239_p11, %s661_s18, 3 }
  0x18   : > { %s508_s30 = sshll.u32 %s757_s29, 5  ;;  %s497_s8 = sshll.u32 %s757_s29, 2 }
  0x19   : > { %s250_s7 = scalar_lea.vmem %s833_s1, %s508_s30  ;;  %s245_s11 = scalar_lea.vmem %s832_s0, %s497_s8 }
  0x1a   : > { %v270_v1 = vld [vmem:[%s250_s7 + $0x10] sm:$0xff]  ;;  %v268_v2 = vld [vmem:[%s250_s7] sm:$0xff]  ;;  %v271_v3 = vld [vmem:[%s250_s7 + $0x18] sm:$0xff]  ;;  %s500_s22 = sshll.u32 %s757_s29, 1  ;;  %s238_s8 = scalar_lea.vmem [#allocation3], %s496_s6 }
  0x1b   : > { %284 = vperm.xlu1 %588, %v270_v1   ;;  %274 = vperm.xlu0 %587, %v268_v2   ;;  %v269_v4 = vld [vmem:[%s250_s7 + $0x8] sm:$0xff]  ;;  %v301_v6 = vld [vmem:[%s245_s11] sm:$0xf]  ;;  %s254_s30 = scalar_lea.vmem %s834_s2, %s500_s22  ;;  %s505_s7 = sshll.u32 %s661_s18, 6 }
  0x1c   : > { %v302_v7 = vunpack.c.l.bf16 %v301_v6  ;;  %v502_v39 = vld [vmem:[%s254_s30 + $0x1] ss:$0 sm:$0xff]  ;;  %v503_v41 = vld [vmem:[%s254_s30] ss:$0 sm:$0xff]  ;;  %s396_s29 = sshll.u32 %s238_s8, 4  ;;  %s785_s11 = scalar_lea.hbm %s836_s4, %s505_s7  ;;  %s787_s29 = int_to_ptr.vmem [resolvable:$true] %s396_s29 }
  0x1d   : > { %s591_s13 = scalar_lea.vmem %s787_s29, 64  ;;  %s674_s18 = smov [#allocation3]  }
  0x1e   : > { %v304_v8 = vsel %vm303_vm1, %v302_v7, 0.0  ;;  %v307_v9 = vmul.f32 %v302_v7, %v302_v7  ;;  %p592_p12 = scmp.ne.s32.totalorder %s787_s29, %s591_s13  ;;  %s595_s14 = sshll.u32 %s674_s18, 4  ;;  %s596_s14 = int_to_ptr.vmem [resolvable:$false] %s595_s14 }
  0x1f   : > { %289 = vperm.xlu1 %588, %v271_v3   ;;  %279 = vperm.xlu0 %587, %v269_v4   ;;  %s597_s21 = scalar_lea.vmem %s596_s14, 128  ;;  %p598_p1 = scmp.lt.s32.totalorder %s787_s29, %s596_s14 }
  0x20   : > { %v308_v10 = vsel %vm303_vm1, %v307_v9, 0.0  ;;  %p593_p13 = pnand %p592_p12, %p740_p4  ;;  %p599_p2 = scmp.lt.s32.totalorder %s597_s21, %s591_s13 }
  0x22   : > { %p594_p0 = pneg %p593_p13  ;;  %p600_p3 = por %p599_p2, %p598_p1 }
  0x24   : > { %p601_p5 = pnand %p600_p3, %p594_p0 }
  0x3e   : > { %305 = vadd.xlane.f32.xlu0 %v304_v8 }
  0x43   : > { %309 = vadd.xlane.f32.xlu1 %v308_v10 }
  0x9a   : > { %v285_v14 = vpop.permute.xlu1 %284  ;;  %v275_v15 = vpop.permute.xlu0 %274 }
  0x9b   : > { %v294_v19 = vmul.f32 %v515_v13, %v285_v14  ;;  %v292_v22 = vmul.f32 %v511_v16, %v275_v15 }
  0x9e   : > { %v290_v20 = vpop.permute.xlu1 %289  ;;  %v280_v21 = vpop.permute.xlu0 %279 }
  0x9f   : > { %v295_v23 = vmul.f32 %v516_v17, %v290_v20  ;;  %v293_v24 = vmul.f32 %v512_v18, %v280_v21 }
  0xa1   : > { %v297_v25 = vpack.c.bf16 %v295_v23, %v294_v19  ;;  %v296_v26 = vpack.c.bf16 %v293_v24, %v292_v22 }
  0xa3   : > { %300 = vst.msk [vmem:[#allocation2 + $0x8] sm:$0xff] %vm298_vm2, %v297_v25  ;;  %299 = vst.msk [vmem:[#allocation2] sm:$0xff] %vm298_vm2, %v296_v26 }
  0xaa   : > { %v318_v27 = vld [vmem:[#allocation2] sm:$0xff]  ;;  %v319_v28 = vld [vmem:[#allocation2 + $0x8] sm:$0xff] }
  0xab   : > { %522 = vmatpush3.bf16.msra.mxu0 %v318_v27 }
  0xac   : > { %523 = vmatprep.subr.bf16.mxu0 %v672_v5 }
  0xaf   : > { %524 = vmatpush3.bf16.msra.mxu0 %v319_v28 }
  0xb2   : > { %526 = vmatmul.mubr.msk.bf16.vlgmr.msra.gmra.mrb[0].mxu0 %vm303_vm1, %v301_v6 }
  0xcb   : > { %v306_v29 = vpop.xlane.xlu0 %305 }
  0xcc   : > { %v311_v30 = vmul.f32 0.03125, %v306_v29 }
  0xce   : > { %v313_v32 = vmul.f32 %v311_v30, %v311_v30 }
  0xd0   : > { %v310_v31 = vpop.xlane.xlu1 %309 }
  0xd1   : > { %v312_v33 = vmul.f32 0.03125, %v310_v31 }
  0xd3   : > { %v314_v34 = vsub.f32 %v312_v33, %v313_v32 }
  0xd5   : > { %v315_v35 = vmax.f32 %v314_v34, 0.0 }
  0xd7   : > { %v316_v36 = vadd.f32 1e-06, %v315_v35 }
  0xd9   : > { %589 = vrsqrt.f32 %v316_v36 }
  0xe3   : > { %v590_v37 = vpop.eup %589 }
  0xe4   : > { %v366_v38 = vmul.f32 %v590_v37, %v311_v30 }
  0xe6   : > { %v371_v40 = vmul.f32 %v502_v39, %v366_v38 }
  0xe8   : > { %v376_v44 = vsub.f32 %v503_v41, %v371_v40 }
 0x185   : > { %v357_v42 = vpop.f32.mrb[0].mxu0 }
 0x186   : > { %v365_v43 = vmul.f32 %v590_v37, %v357_v42  ;;  %v527_v45 = vpop.f32.mrb[1].mxu0 }
 0x187   : > { %v360_v46 = vpop.f32.mrb[2].mxu0 }
 0x188   : > { %v377_v47 = vadd.f32 %v376_v44, %v365_v43  ;;  %v528_v48 = vpop.f32.mrb[3].mxu0 }
 0x18a   : > { %v378_v49 = vpack.c.bf16 %v377_v47, %v377_v47 }
 0x18c   : > { %380 = vst.msk [vmem:[%s238_s8] sm:$0xf] %vm379_vm3, %v378_v49 }
 0x18d   : > { %604 = shalt.err (!%p601_p5)
}
 0x18e   : > { %s605_s22 = scalar_lea.hbm %s785_s11, 64  ;;  %s609_s30 = scalar_lea.hbm %s836_s4, 256 }
 0x18f   : > { %p606_p6 = scmp.ne.s32.totalorder %s785_s11, %s605_s22  ;;  %p610_p10 = scmp.lt.u32.totalorder %s785_s11, %s836_s4 }
 0x190   : > { %p611_p11 = scmp.lt.u32.totalorder %s609_s30, %s605_s22  ;;  %p613_p13 = scmp.lt.u32.totalorder %s605_s22, %s785_s11 }
 0x191   : > { %p607_p7 = pnand %p606_p6, %p740_p4 }
 0x192   : > { %p612_p12 = por %p611_p11, %p610_p10 }
 0x193   : > { %p608_p9 = pneg %p607_p7 }
 0x194   : > { %p614_p0 = por %p613_p13, %p612_p12 }
 0x196   : > { %p615_p1 = pnand %p614_p0, %p608_p9 }
 0x198   : > { %618 = shalt.err (!%p615_p1)
}
 0x199   : > { %529 = dma.vmem_to_hbm [thread:$0]  (%p740_p4), %s787_s29, 64, %s785_s11, %s382_s12  }
 0x19a PF: > { %p535_p2 = scmp.ge.s32.totalorder %s669_s20, 2  ;;  %s408_s7 = sand.u32 1, %s649_s15  }
 0x19b   : > { %s409_s8 = scalar_lea.sflag [#allocation4], %s408_s7 }
 0x19c   : > { %p532_p3 = pnand %p535_p2, %p747_p8 }
 0x19e   : > { %644 = dma.done.wait (!%p532_p3), %s409_s8, 64  }
 0x19f   : > { %646 = vsyncadd (!%p532_p3), %s409_s8, 4294967232  ;;  %s17_s20 = sadd.s32 1, %s669_s20   ;;  %s839_s15 = smov %s653_s16 }
 0x1a0   : > { %p14_p5 = scmp.ge.s32.totalorder %s17_s20, 6   ;;  %s840_s16 = smov %s657_s17 }
 0x1a1   : > { %s841_s17 = smov %s753_s28  ;;  %s842_s18 = smov %s665_s19 }
 0x1a2   : > { %s843_s19 = smov %s845_s23  ;;  %16 = sbr.rel (!%p14_p5) target bundleno = 4 (0x4), region = 81 }
 0x1a9   :  { %414 = vsyncpa [#allocation4], 1 }
 0x1aa   :  { %416 = vsyncpa [#allocation4 + $0x1], 1 }

</bundles_post_ra>
